<compile_context>
chip_gen: v6e
topology: v6e:2x2x1
jax: 0.10.0
libtpu: 0.0.40
codegen_flags: <defaults>
</compile_context>

<pallas_src>
import functools

import jax
import jax.numpy as jnp
from jax.experimental import pallas as pl
from jax.experimental.pallas import tpu as pltpu

HIDDEN = 64          # logical hidden width (matches the PyTorch module)
HIDDEN_PAD = 128     # lane-dense padded hidden width


def _round_up(n, m):
    return ((n + m - 1) // m) * m


def policy_net_kernel(x_ref, w1_ref, b1_ref, w2_ref, b2_ref, w3_ref, b3_ref,
                      o_ref):
    # x_ref: (TM, in_dim) f32; weights bf16 (hidden padded to 128 lanes);
    # biases f32; o_ref: (TM, out_dim) f32.
    x = x_ref[...].astype(jnp.bfloat16)        # in-kernel cast (cheap VPU op)

    # fc1 + ReLU (bf16 MXU inputs, f32 accumulate + epilogue)
    h1 = jnp.dot(x, w1_ref[...], preferred_element_type=jnp.float32)
    h1 = jnp.maximum(h1 + b1_ref[...], 0.0)

    # fc2 + ReLU
    h2 = jnp.dot(h1.astype(jnp.bfloat16), w2_ref[...],
                 preferred_element_type=jnp.float32)
    h2 = jnp.maximum(h2 + b2_ref[...], 0.0)

    # fc3 + Tanh (EUP); store is exactly out_dim lanes wide (no padded writeback)
    h3 = jnp.dot(h2.astype(jnp.bfloat16), w3_ref[...],
                 preferred_element_type=jnp.float32)
    o_ref[...] = jnp.tanh(h3 + b3_ref[...]).astype(o_ref.dtype)


def prepare_params(params):
    """One-time pad + bf16 cast of weights/biases (hoisted out of the hot path).

    Weights stored as (in_features, out_features); biases as (1, out_features).
    """
    w1, b1, w2, b2, w3, b3 = (params["w1"], params["b1"], params["w2"],
                              params["b2"], params["w3"], params["b3"])
    in_dim = w1.shape[0]
    out_dim = w3.shape[1]
    assert w1.shape[1] == HIDDEN, "fc1 out width must be 64"
    assert w2.shape == (HIDDEN, HIDDEN), "fc2 must be 64x64"
    assert w3.shape[0] == HIDDEN, "fc3 in width must be 64"

    bf = jnp.bfloat16
    w1p = jnp.zeros((in_dim, HIDDEN_PAD), bf).at[:, :HIDDEN].set(w1.astype(bf))
    b1p = jnp.zeros((1, HIDDEN_PAD), jnp.float32).at[:, :HIDDEN].set(b1)
    w2p = jnp.zeros((HIDDEN_PAD, HIDDEN_PAD), bf).at[:HIDDEN, :HIDDEN].set(
        w2.astype(bf))
    b2p = jnp.zeros((1, HIDDEN_PAD), jnp.float32).at[:, :HIDDEN].set(b2)
    # fc3: pad only the contraction (input) dim; output width stays out_dim so
    # the kernel writes exactly (tm, out_dim) to HBM.
    w3p = jnp.zeros((HIDDEN_PAD, out_dim), bf).at[:HIDDEN, :].set(w3.astype(bf))
    b3p = b3.astype(jnp.float32).reshape(1, out_dim)

    return {"w1": w1p, "b1": b1p, "w2": w2p, "b2": b2p, "w3": w3p, "b3": b3p,
            "in_dim": in_dim, "out_dim": out_dim}


def _pick_tile(batch):
    """Batch tile: big tiles (<=1024 rows) to approach HBM roofline, sized to
    minimize row-padding waste; >=2 grid steps for large batches (megacore)."""
    if batch <= 256:
        return _round_up(max(batch, 1), 8)
    num_tiles = max(2, pl.cdiv(batch, 1024))
    return _round_up(pl.cdiv(batch, num_tiles), 8)


@functools.partial(jax.jit, static_argnames=("tm",))
def policy_network_forward(x, prepared, *, tm=None):
    """x: (batch, input_dim) float32; prepared: output of prepare_params().

    Returns (batch, output_dim) float32.
    """
    w1p, b1p, w2p, b2p, w3p, b3p = (prepared["w1"], prepared["b1"],
                                    prepared["w2"], prepared["b2"],
                                    prepared["w3"], prepared["b3"])
    batch = x.shape[0]
    in_dim = w1p.shape[0]
    out_dim = w3p.shape[1]
    assert x.shape[1] == in_dim, "input feature dim mismatch"

    if tm is None:
        tm = _pick_tile(batch)
    batch_pad = _round_up(batch, tm)
    grid = (batch_pad // tm,)

    # Row-pad x only when the batch isn't tile-aligned (zero rows are harmless
    # and sliced off below); no dtype conversion here -- the kernel casts.
    xp = x if batch_pad == batch else jnp.pad(x, ((0, batch_pad - batch), (0, 0)))

    # Advisory cost estimate so XLA can overlap this kernel with neighbors.
    flops = 2 * batch_pad * (in_dim * HIDDEN_PAD
                             + HIDDEN_PAD * HIDDEN_PAD
                             + HIDDEN_PAD * out_dim)
    bytes_accessed = (batch_pad * in_dim * 4
                      + (w1p.size + w2p.size + w3p.size) * 2
                      + (b1p.size + b2p.size + b3p.size) * 4
                      + batch_pad * out_dim * 4)
    cost = pl.CostEstimate(flops=flops,
                           transcendentals=batch_pad * out_dim,
                           bytes_accessed=bytes_accessed)

    # Footprint-derived VMEM budget: double-buffered x/out tiles + resident
    # weights/biases (conservatively x2) + headroom; safe floor 8 MiB.
    vmem_bytes = (2 * (tm * in_dim * 4 + tm * out_dim * 4)
                  + 2 * (w1p.size + w2p.size + w3p.size) * 2
                  + 2 * (b1p.size + b2p.size + b3p.size) * 4)
    vmem_bytes = max(vmem_bytes + (4 << 20), 8 << 20)

    out = pl.pallas_call(
        policy_net_kernel,
        out_shape=jax.ShapeDtypeStruct((batch_pad, out_dim), jnp.float32),
        grid=grid,
        in_specs=[
            pl.BlockSpec((tm, in_dim), lambda i: (i, 0)),               # x tile
            pl.BlockSpec((in_dim, HIDDEN_PAD), lambda i: (0, 0)),       # w1 resident
            pl.BlockSpec((1, HIDDEN_PAD), lambda i: (0, 0)),            # b1 resident
            pl.BlockSpec((HIDDEN_PAD, HIDDEN_PAD), lambda i: (0, 0)),   # w2
            pl.BlockSpec((1, HIDDEN_PAD), lambda i: (0, 0)),            # b2
            pl.BlockSpec((HIDDEN_PAD, out_dim), lambda i: (0, 0)),      # w3
            pl.BlockSpec((1, out_dim), lambda i: (0, 0)),               # b3
        ],
        out_specs=pl.BlockSpec((tm, out_dim), lambda i: (i, 0)),
        compiler_params=pltpu.CompilerParams(
            dimension_semantics=("parallel",),
            vmem_limit_bytes=vmem_bytes,
        ),
        cost_estimate=cost,
    )(xp, w1p, b1p, w2p, b2p, w3p, b3p)

    return out if batch_pad == batch else out[:batch]


def init_params(key, input_dim, hidden, output_dim):
    """Deterministic init mimicking PyTorch nn.Linear (uniform +-1/sqrt(fan_in)).

    Weights stored as (in_features, out_features); biases as (1, out_features).
    """
    ks = jax.random.split(key, 6)

    def linear(kw, kb, fan_in, fan_out):
        bound = 1.0 / jnp.sqrt(float(fan_in))
        w = jax.random.uniform(kw, (fan_in, fan_out), jnp.float32,
                               minval=-bound, maxval=bound)
        b = jax.random.uniform(kb, (1, fan_out), jnp.float32,
                               minval=-bound, maxval=bound)
        return w, b

    w1, b1 = linear(ks[0], ks[1], input_dim, hidden)
    w2, b2 = linear(ks[2], ks[3], hidden, hidden)
    w3, b3 = linear(ks[4], ks[5], hidden, output_dim)
    return {"w1": w1, "b1": b1, "w2": w2, "b2": b2, "w3": w3, "b3": b3}


def reference_forward_f32(x, p):
    h1 = jnp.maximum(x @ p["w1"] + p["b1"], 0.0)
    h2 = jnp.maximum(h1 @ p["w2"] + p["b2"], 0.0)
    return jnp.tanh(h2 @ p["w3"] + p["b3"])


def reference_forward_bf16(x, p):
    bf = jnp.bfloat16
    h1 = jnp.dot(x.astype(bf), p["w1"].astype(bf),
                 preferred_element_type=jnp.float32) + p["b1"]
    h1 = jnp.maximum(h1, 0.0)
    h2 = jnp.dot(h1.astype(bf), p["w2"].astype(bf),
                 preferred_element_type=jnp.float32) + p["b2"]
    h2 = jnp.maximum(h2, 0.0)
    h3 = jnp.dot(h2.astype(bf), p["w3"].astype(bf),
                 preferred_element_type=jnp.float32) + p["b3"]
    return jnp.tanh(h3)


if __name__ == "__main__":
    batch, input_dim, hidden, output_dim = 8, 32, 64, 8

    key = jax.random.PRNGKey(0)
    k_params, k_x = jax.random.split(key)
    params = init_params(k_params, input_dim, hidden, output_dim)
    x = jax.random.normal(k_x, (batch, input_dim), jnp.float32)

    # One-time parameter prep (pad + bf16 cast), outside the hot path.
    prepared = prepare_params(params)

    out = jax.block_until_ready(policy_network_forward(x, prepared))
    assert out.shape == (batch, output_dim)

    # Tight check vs a bf16-matmul / f32-accumulate reference (same arithmetic).
    ref_bf16 = jax.block_until_ready(reference_forward_bf16(x, params))
    assert jnp.allclose(out, ref_bf16, atol=1e-3, rtol=1e-3), \
        "mismatch vs bf16 reference"

    # Loose check vs the full-f32 PyTorch-semantics reference.
    # TODO(synk): if bit-level parity with PyTorch f32 matmuls is required,
    # switch the in-kernel matmul operands to f32 (slower, still HBM-bound).
    ref_f32 = jax.block_until_ready(reference_forward_f32(x, params))
    assert jnp.allclose(out, ref_f32, atol=3e-2, rtol=3e-2), \
        "mismatch vs f32 reference"

    print("KERNEL_OK")
</pallas_src>

<mosaic_0001>
module attributes {stable_mosaic.version = 11 : i64} {
  func.func @policy_net_kernel(%arg0: i32, %arg1: memref<8x32xf32, #tpu.memory_space<vmem>>, %arg2: memref<32x128xbf16, #tpu.memory_space<vmem>>, %arg3: memref<1x128xf32, #tpu.memory_space<vmem>>, %arg4: memref<128x128xbf16, #tpu.memory_space<vmem>>, %arg5: memref<1x128xf32, #tpu.memory_space<vmem>>, %arg6: memref<128x8xbf16, #tpu.memory_space<vmem>>, %arg7: memref<1x8xf32, #tpu.memory_space<vmem>>, %arg8: memref<8x8xf32, #tpu.memory_space<vmem>>) attributes {dimension_semantics = [#tpu.dimension_semantics<parallel>], iteration_bounds = array<i64: 1>, scalar_prefetch = 0 : i64, scratch_operands = 0 : i64, tpu.core_type = #tpu.core_type<tc>, window_params = [{transform_indices = @transform_0, window_bounds = array<i64: 8, 32>}, {pipeline_mode = #tpu.pipeline_mode<synchronous>, transform_indices = @transform_1, window_bounds = array<i64: 32, 128>}, {pipeline_mode = #tpu.pipeline_mode<synchronous>, transform_indices = @transform_2, window_bounds = array<i64: 1, 128>}, {pipeline_mode = #tpu.pipeline_mode<synchronous>, transform_indices = @transform_3, window_bounds = array<i64: 128, 128>}, {pipeline_mode = #tpu.pipeline_mode<synchronous>, transform_indices = @transform_4, window_bounds = array<i64: 1, 128>}, {pipeline_mode = #tpu.pipeline_mode<synchronous>, transform_indices = @transform_5, window_bounds = array<i64: 128, 8>}, {pipeline_mode = #tpu.pipeline_mode<synchronous>, transform_indices = @transform_6, window_bounds = array<i64: 1, 8>}, {transform_indices = @transform_7, window_bounds = array<i64: 8, 8>}]} {
    %c0 = arith.constant 0 : index
    %c0_0 = arith.constant 0 : index
    %0 = vector.load %arg1[%c0, %c0_0] : memref<8x32xf32, #tpu.memory_space<vmem>>, vector<8x32xf32>
    %1 = arith.truncf %0 : vector<8x32xf32> to vector<8x32xbf16>
    %c0_1 = arith.constant 0 : index
    %c0_2 = arith.constant 0 : index
    %2 = vector.load %arg2[%c0_1, %c0_2] : memref<32x128xbf16, #tpu.memory_space<vmem>>, vector<32x128xbf16>
    %cst = arith.constant dense<0.000000e+00> : vector<8x128xf32>
    %3 = tpu.matmul %1, %2, %cst {dimension_numbers = #tpu.dot_dimension_numbers<[1], [0], [0], [1], [0, 0, 1, 1], [], []>} : vector<8x32xbf16>, vector<32x128xbf16>, vector<8x128xf32> -> vector<8x128xf32>
    %c0_3 = arith.constant 0 : index
    %c0_4 = arith.constant 0 : index
    %4 = vector.load %arg3[%c0_3, %c0_4] : memref<1x128xf32, #tpu.memory_space<vmem>>, vector<1x128xf32>
    %5 = vector.broadcast %4 : vector<1x128xf32> to vector<8x128xf32>
    %6 = arith.addf %3, %5 : vector<8x128xf32>
    %cst_5 = arith.constant 0.000000e+00 : f32
    %7 = vector.broadcast %cst_5 : f32 to vector<8x128xf32>
    %8 = arith.maximumf %6, %7 : vector<8x128xf32>
    %9 = arith.truncf %8 : vector<8x128xf32> to vector<8x128xbf16>
    %c0_6 = arith.constant 0 : index
    %c0_7 = arith.constant 0 : index
    %10 = vector.load %arg4[%c0_6, %c0_7] : memref<128x128xbf16, #tpu.memory_space<vmem>>, vector<128x128xbf16>
    %cst_8 = arith.constant dense<0.000000e+00> : vector<8x128xf32>
    %11 = tpu.matmul %9, %10, %cst_8 {dimension_numbers = #tpu.dot_dimension_numbers<[1], [0], [0], [1], [0, 0, 1, 1], [], []>} : vector<8x128xbf16>, vector<128x128xbf16>, vector<8x128xf32> -> vector<8x128xf32>
    %c0_9 = arith.constant 0 : index
    %c0_10 = arith.constant 0 : index
    %12 = vector.load %arg5[%c0_9, %c0_10] : memref<1x128xf32, #tpu.memory_space<vmem>>, vector<1x128xf32>
    %13 = vector.broadcast %12 : vector<1x128xf32> to vector<8x128xf32>
    %14 = arith.addf %11, %13 : vector<8x128xf32>
    %cst_11 = arith.constant 0.000000e+00 : f32
    %15 = vector.broadcast %cst_11 : f32 to vector<8x128xf32>
    %16 = arith.maximumf %14, %15 : vector<8x128xf32>
    %17 = arith.truncf %16 : vector<8x128xf32> to vector<8x128xbf16>
    %c0_12 = arith.constant 0 : index
    %c0_13 = arith.constant 0 : index
    %18 = vector.load %arg6[%c0_12, %c0_13] : memref<128x8xbf16, #tpu.memory_space<vmem>>, vector<128x8xbf16>
    %cst_14 = arith.constant dense<0.000000e+00> : vector<8x8xf32>
    %19 = tpu.matmul %17, %18, %cst_14 {dimension_numbers = #tpu.dot_dimension_numbers<[1], [0], [0], [1], [0, 0, 1, 1], [], []>} : vector<8x128xbf16>, vector<128x8xbf16>, vector<8x8xf32> -> vector<8x8xf32>
    %c0_15 = arith.constant 0 : index
    %c0_16 = arith.constant 0 : index
    %20 = vector.load %arg7[%c0_15, %c0_16] : memref<1x8xf32, #tpu.memory_space<vmem>>, vector<1x8xf32>
    %21 = vector.broadcast %20 : vector<1x8xf32> to vector<8x8xf32>
    %22 = arith.addf %19, %21 : vector<8x8xf32>
    %23 = math.tanh %22 : vector<8x8xf32>
    %c0_17 = arith.constant 0 : index
    %c0_18 = arith.constant 0 : index
    %24 = vector.load %arg8[%c0_17, %c0_18] : memref<8x8xf32, #tpu.memory_space<vmem>>, vector<8x8xf32>
    tpu.vector_store %arg8[%c0_17, %c0_18], %23 {strides = array<i32>} : memref<8x8xf32, #tpu.memory_space<vmem>>, vector<8x8xf32>,
    return
  }
  func.func @transform_0(%arg0: i32) -> (i32, i32) {
    %c0_i32 = arith.constant 0 : i32
    %c0_i32_0 = arith.constant 0 : i32
    return %arg0, %c0_i32 : i32, i32
  }
  func.func @transform_1(%arg0: i32) -> (i32, i32) {
    %c0_i32 = arith.constant 0 : i32
    %c0_i32_0 = arith.constant 0 : i32
    %c0_i32_1 = arith.constant 0 : i32
    return %c0_i32, %c0_i32_0 : i32, i32
  }
  func.func @transform_2(%arg0: i32) -> (i32, i32) {
    %c0_i32 = arith.constant 0 : i32
    %c0_i32_0 = arith.constant 0 : i32
    %c0_i32_1 = arith.constant 0 : i32
    return %c0_i32, %c0_i32_0 : i32, i32
  }
  func.func @transform_3(%arg0: i32) -> (i32, i32) {
    %c0_i32 = arith.constant 0 : i32
    %c0_i32_0 = arith.constant 0 : i32
    %c0_i32_1 = arith.constant 0 : i32
    return %c0_i32, %c0_i32_0 : i32, i32
  }
  func.func @transform_4(%arg0: i32) -> (i32, i32) {
    %c0_i32 = arith.constant 0 : i32
    %c0_i32_0 = arith.constant 0 : i32
    %c0_i32_1 = arith.constant 0 : i32
    return %c0_i32, %c0_i32_0 : i32, i32
  }
  func.func @transform_5(%arg0: i32) -> (i32, i32) {
    %c0_i32 = arith.constant 0 : i32
    %c0_i32_0 = arith.constant 0 : i32
    %c0_i32_1 = arith.constant 0 : i32
    return %c0_i32, %c0_i32_0 : i32, i32
  }
  func.func @transform_6(%arg0: i32) -> (i32, i32) {
    %c0_i32 = arith.constant 0 : i32
    %c0_i32_0 = arith.constant 0 : i32
    %c0_i32_1 = arith.constant 0 : i32
    return %c0_i32, %c0_i32_0 : i32, i32
  }
  func.func @transform_7(%arg0: i32) -> (i32, i32) {
    %c0_i32 = arith.constant 0 : i32
    %c0_i32_0 = arith.constant 0 : i32
    return %arg0, %c0_i32 : i32, i32
  }
}

</mosaic_0001>

<bundles_post_ra>
// kernel: policy_network_forward.1
= control target key start
LH: loop header
LB: loop body
LE: loop exit
PB: predicated region body
PF: predicated region fallthrough
CT: control target
= control target key end

     0   :  { %12 = vsyncpa [#allocation3], 0  ;;  %s689_s0 = inlined_call_operand.vmem [shape: f32[8,32], index: 0, kind: input, shape index: {}]   ;;  %s690_s1 = inlined_call_operand.hbm [shape: bf16[32,128], index: 1, kind: input, shape index: {}]   ;;  %s691_s2 = inlined_call_operand.vmem [shape: f32[1,128], index: 2, kind: input, shape index: {}]   ;;  %s692_s3 = inlined_call_operand.vmem [shape: bf16[128,128], index: 3, kind: input, shape index: {}]   ;;  %s693_s4 = inlined_call_operand.vmem [shape: f32[1,128], index: 4, kind: input, shape index: {}]   ;;  %s694_s5 = inlined_call_operand.vmem [shape: bf16[128,8], index: 5, kind: input, shape index: {}]   ;;  %s695_s6 = inlined_call_operand.hbm [shape: f32[1,8], index: 6, kind: input, shape index: {}]   ;;  %s696_s7 = inlined_call_operand.hbm [shape: f32[8,8], index: 7, kind: output, shape index: {}]  }
   0x1   :  { %13 = vsyncpa [#allocation6], 0 }
   0x2   :  { %14 = vsyncpa [#allocation4], 0  ;;  %s552_s24 = smov [#allocation2]  }
   0x3   :  { %s22_s25 = sshll.u32 %s552_s24, 4  ;;  %s23_s25 = int_to_ptr.vmem [resolvable:$true] %s22_s25 }
   0x4   :  { %s494_s26 = scalar_lea.vmem %s23_s25, 256  ;;  %p499_p1 = scmp.lt.s32.totalorder %s23_s25, %s23_s25 }
   0x5   :  { %p495_p0 = scmp.ne.s32.totalorder %s23_s25, %s494_s26  ;;  %p500_p2 = scmp.lt.s32.totalorder %s494_s26, %s494_s26 }
   0x7   :  { %p501_p3 = por %p500_p2, %p499_p1 }
   0x9   :  { %p502_p4 = pnand %p501_p3, %p495_p0 }
   0xb   :  { %505 = shalt.err (!%p502_p4)
}
   0xc   :  { %s553_s27 = smov 64   ;;  %s554_s28 = smov 4  }
   0xd   :  { %28 = dma.hbm_to_vmem [thread:$0]  %s690_s1, 256, %s23_s25, [#allocation3], %s553_s27, %s553_s27, %s554_s28  }
   0xe   :  { %s555_s8 = smov [#allocation5]  }
   0xf   :  { %s43_s9 = sshll.u32 %s555_s8, 4  ;;  %s44_s9 = int_to_ptr.vmem [resolvable:$true] %s43_s9 }
  0x10   :  { %s514_s10 = scalar_lea.vmem %s44_s9, 16  ;;  %s518_s11 = scalar_lea.vmem %s44_s9, 32 }
  0x11   :  { %p515_p5 = scmp.ne.s32.totalorder %s44_s9, %s514_s10  ;;  %p519_p6 = scmp.lt.s32.totalorder %s44_s9, %s44_s9 }
  0x12   :  { %p520_p7 = scmp.lt.s32.totalorder %s518_s11, %s514_s10 }
  0x14   :  { %p521_p8 = por %p520_p7, %p519_p6 }
  0x16   :  { %p522_p9 = pnand %p521_p8, %p515_p5 }
  0x18   :  { %525 = shalt.err (!%p522_p9)
}
  0x19   :  { %46 = dma.hbm_to_vmem [thread:$0]  %s695_s6, 16, %s44_s9, [#allocation6]  }
  0x1a   :  { %546 = dma.done.wait [#allocation3], 256  }
  0x1b   :  { %547 = vsyncadd [#allocation3], 4294967040 }
  0x1c   :  { %548 = dma.done.wait [#allocation6], 16  }
  0x1d   :  { %549 = vsyncadd [#allocation6], 4294967280  ;;  %v556_v0 = vmov 0.0   ;;  %vm557_vm0 = vmmov 0   ;;  %v466_v1 = vld [vmem:[#allocation2 + $0x8] sm:$0xff]   ;;  %v467_v2 = vld [vmem:[#allocation2] sm:$0xff]  }
  0x1e   :  { %411 = vmatprep.subr.bf16.mxu0 %v556_v0  ;;  %415 = vmatprep.mubr.msk.bf16.mxu0 %vm557_vm0, %v556_v0  ;;  %v54_v3 = vld [vmem:[%s689_s0] sm:$0xff]  ;;  %v468_v4 = vld [vmem:[%s692_s3 + $0x38] sm:$0xff]   ;;  %v469_v6 = vld [vmem:[%s692_s3 + $0x30] sm:$0xff]   ;;  %vm79_vm1 = vcmask 261120   ;;  %vm350_vm2 = vcmask 64512  }
  0x1f   :  { %419 = vmatprep.subr.bf16.mxu1 %v556_v0  ;;  %435 = vmatprep.mubr.msk.bf16.mxu1 %vm557_vm0, %v556_v0  ;;  %v55_v5 = vpack.c.bf16 %v54_v3, %v54_v3  ;;  %v470_v7 = vld [vmem:[%s692_s3 + $0x28] sm:$0xff]   ;;  %v471_v8 = vld [vmem:[%s692_s3 + $0x20] sm:$0xff]   ;;  %v472_v9 = vld [vmem:[%s692_s3 + $0x18] sm:$0xff]  }
  0x20   :  { %412 = vmatpush3.bf16.msra.mxu0 %v466_v1  ;;  %420 = vmatpush3.bf16.msra.mxu1 %v468_v4  ;;  %v473_v10 = vld [vmem:[%s692_s3 + $0x10] sm:$0xff]   ;;  %v474_v11 = vld [vmem:[%s692_s3 + $0x8] sm:$0xff]   ;;  %v475_v12 = vld [vmem:[%s692_s3] sm:$0xff]  }
  0x21   :  { %413 = vmatprep.subr.bf16.mxu0 %v556_v0  ;;  %421 = vmatprep.subr.bf16.mxu1 %v556_v0  ;;  %v476_v13 = vld [vmem:[%s694_s5 + $0x38] sm:$0xff]   ;;  %v477_v14 = vld [vmem:[%s694_s5 + $0x30] sm:$0xff]   ;;  %v478_v15 = vld [vmem:[%s694_s5 + $0x28] sm:$0xff]  }
  0x22   :  { %v479_v16 = vld [vmem:[%s694_s5 + $0x20] sm:$0xff]   ;;  %v480_v17 = vld [vmem:[%s694_s5 + $0x18] sm:$0xff]   ;;  %v481_v18 = vld [vmem:[%s694_s5 + $0x10] sm:$0xff]  }
  0x23   :  { %v368_v19 = vld [vmem:[%s691_s2] ss:$0 sm:$0xff]  ;;  %v482_v27 = vld [vmem:[%s694_s5 + $0x8] sm:$0xff]   ;;  %v381_v37 = vld [vmem:[#allocation5] ss:$0 sm:$0xff] }
  0x24   :  { %414 = vmatpush3.bf16.msra.mxu0 %v467_v2  ;;  %422 = vmatpush3.bf16.msra.mxu1 %v469_v6  ;;  %v483_v28 = vld [vmem:[%s694_s5] sm:$0xff]   ;;  %s558_s5 = smov [#allocation7]  }
  0x25   :  { %439 = vmatprep.subr.bf16.mxu0 %v556_v0  ;;  %423 = vmatprep.subr.bf16.mxu1 %v556_v0  ;;  %v372_v29 = vld [vmem:[%s693_s4] ss:$0 sm:$0xff]  ;;  %s358_s21 = sshll.u32 %s558_s5, 4  ;;  %s359_s21 = int_to_ptr.vmem [resolvable:$true] %s358_s21 }
  0x26   :  { %s526_s4 = scalar_lea.vmem %s359_s21, 128  ;;  %p531_p11 = scmp.lt.s32.totalorder %s359_s21, %s359_s21 }
  0x27   :  { %416 = vmatmul.mubr.msk.bf16.vlgmr.msra.gmra.mxu0 %vm79_vm1, %v55_v5  ;;  %p527_p10 = scmp.ne.s32.totalorder %s359_s21, %s526_s4  ;;  %p532_p12 = scmp.lt.s32.totalorder %s526_s4, %s526_s4 }
  0x28   :  { %455 = vmatprep.mubr.msk.bf16.mxu0 %vm557_vm0, %v556_v0  ;;  %424 = vmatpush3.bf16.msra.mxu1 %v470_v7 }
  0x29   :  { %425 = vmatprep.subr.bf16.mxu1 %v556_v0  ;;  %440 = vmatpush3.bf16.msra.mxu0 %v476_v13  ;;  %p533_p13 = por %p532_p12, %p531_p11 }
  0x2a   :  { %441 = vmatprep.subr.bf16.mxu0 %v556_v0 }
  0x2b   :  { %p534_p0 = pnand %p533_p13, %p527_p10 }
  0x2c   :  { %426 = vmatpush3.bf16.msra.mxu1 %v471_v8 }
  0x2d   :  { %427 = vmatprep.subr.bf16.mxu1 %v556_v0  ;;  %442 = vmatpush3.bf16.msra.mxu0 %v477_v14 }
  0x2e   :  { %443 = vmatprep.subr.bf16.mxu0 %v556_v0 }
  0x30   :  { %428 = vmatpush3.bf16.msra.mxu1 %v472_v9 }
  0x31   :  { %429 = vmatprep.subr.bf16.mxu1 %v556_v0  ;;  %444 = vmatpush3.bf16.msra.mxu0 %v478_v15 }
  0x32   :  { %445 = vmatprep.subr.bf16.mxu0 %v556_v0 }
  0x34   :  { %430 = vmatpush3.bf16.msra.mxu1 %v473_v10 }
  0x35   :  { %431 = vmatprep.subr.bf16.mxu1 %v556_v0  ;;  %446 = vmatpush3.bf16.msra.mxu0 %v479_v16 }
  0x36   :  { %447 = vmatprep.subr.bf16.mxu0 %v556_v0 }
  0x38   :  { %432 = vmatpush3.bf16.msra.mxu1 %v474_v11 }
  0x39   :  { %433 = vmatprep.subr.bf16.mxu1 %v556_v0  ;;  %448 = vmatpush3.bf16.msra.mxu0 %v480_v17 }
  0x3a   :  { %449 = vmatprep.subr.bf16.mxu0 %v556_v0 }
  0x3c   :  { %434 = vmatpush3.bf16.msra.mxu1 %v475_v12 }
  0x3d   :  { %450 = vmatpush3.bf16.msra.mxu0 %v481_v18 }
  0x3e   :  { %451 = vmatprep.subr.bf16.mxu0 %v556_v0 }
  0x41   :  { %452 = vmatpush3.bf16.msra.mxu0 %v482_v27 }
  0x42   :  { %453 = vmatprep.subr.bf16.mxu0 %v556_v0 }
  0x45   :  { %454 = vmatpush3.bf16.msra.mxu0 %v483_v28 }
  0xe7   :  { %v117_v20 = vpop.f32.mrf.mxu0 }
  0xe8   :  { %v118_v21 = vadd.f32 %v368_v19, %v117_v20 }
  0xe9   :  { %v417_v22 = vpop.f32.mrf.mxu0 }
  0xea   :  { %v123_v23 = vmax.f32 %v118_v21, 0.0 }
  0xeb   :  { %v120_v24 = vpop.f32.mrf.mxu0 }
  0xec   :  { %v124_v25 = vpack.c.bf16 %v123_v23, %v123_v23 }
  0xed   :  { %v418_v26 = vpop.f32.mrf.mxu0 }
  0xee   :  { %436 = vmatmul.mubr.bf16.vlgmr.msra.gmra.mxu1 %v124_v25 }
 0x1ae   :  { %v230_v30 = vpop.f32.mrf.mxu1 }
 0x1af   :  { %v231_v31 = vadd.f32 %v372_v29, %v230_v30 }
 0x1b0   :  { %v437_v32 = vpop.f32.mrf.mxu1 }
 0x1b1   :  { %v236_v33 = vmax.f32 %v231_v31, 0.0 }
 0x1b2   :  { %v233_v34 = vpop.f32.mrf.mxu1 }
 0x1b3   :  { %v237_v35 = vpack.c.bf16 %v236_v33, %v236_v33 }
 0x1b4   :  { %v438_v36 = vpop.f32.mrf.mxu1 }
 0x1b5   :  { %456 = vmatmul.mubr.bf16.vlgmr.msra.gmra.mxu0 %v237_v35 }
 0x275   :  { %v343_v38 = vpop.f32.mrf.mxu0 }
 0x276   :  { %v344_v39 = vadd.f32 %v381_v37, %v343_v38 }
 0x277   :  { %v457_v40 = vpop.f32.mrf.mxu0 }
 0x278   :  { %484 = vtanh.f32 %v344_v39 }
 0x279   :  { %v346_v41 = vpop.f32.mrf.mxu0 }
 0x27b   :  { %v458_v42 = vpop.f32.mrf.mxu0 }
 0x285   :  { %v485_v43 = vpop.eup %484 }
 0x286   :  { %351 = vst.msk [vmem:[#allocation7] sm:$0xff] %vm350_vm2, %v485_v43 }
 0x287   :  { %537 = shalt.err (!%p534_p0)
}
 0x288   :  { %361 = dma.vmem_to_hbm [thread:$0]  %s359_s21, 128, %s696_s7, [#allocation4]  }
 0x289   :  { %550 = dma.done.wait [#allocation4], 128  }
 0x28a   :  { %551 = vsyncadd [#allocation4], 4294967168 }
 0x28b   :  { %365 = vsyncpa [#allocation3], 1 }
 0x28c   :  { %366 = vsyncpa [#allocation6], 1 }
 0x28d   :  { %367 = vsyncpa [#allocation4], 1 }

</bundles_post_ra>
